<compile_context>
chip_gen: v7x
topology: tpu7x:2x2x1
jax: 0.10.0
libtpu: 0.0.40
codegen_flags: <defaults>
</compile_context>

<pallas_src>
import jax
import jax.numpy as jnp
from jax.experimental import pallas as pl
from jax.experimental.pallas import tpu as pltpu

_LN10 = 2.302585092994046  # ln(10), matches torch.log(torch.tensor(10.0))

_LANES = 128
_TILE_BYTES = 2 * 1024 * 1024        # ~2 MiB tiles: >=85% HBM roofline, v5e-safe
_MEGACORE_MIN_BYTES = 512 * 1024     # split into >=2 grid steps above this size


def _exp10_kernel(x_ref, o_ref):
    # 10**x == exp(x * ln10).  Upcast to f32 in-register (DMA stays in the input
    # dtype, so bf16 inputs move half the HBM bytes); downcast on store.
    x = x_ref[...].astype(jnp.float32)
    o_ref[...] = jnp.exp(x * jnp.float32(_LN10)).astype(o_ref.dtype)


def exponential_layer(x):
    """Pallas TPU implementation of ExponentialLayer.forward: exp(x * ln(10))."""
    orig_shape = x.shape
    orig_dtype = x.dtype
    itemsize = jnp.dtype(orig_dtype).itemsize

    flat = x.reshape(-1)
    n = flat.shape[0]

    # Only pad to a multiple of the 128-lane width (at most 127 elements) when the
    # element count is ragged; common NN shapes (incl. the demo) take the no-pad path.
    # TODO(synk): a masked in-kernel tail would remove this last pad/slice pass too.
    rem = n % _LANES
    if rem != 0:
        flat = jnp.pad(flat, (0, _LANES - rem))
    rows = flat.shape[0] // _LANES
    x2d = flat.reshape(rows, _LANES)

    # Dtype-dependent sublane granule: 8 rows f32, 16 bf16, 32 int8/fp8
    # (sub-32-bit dtypes pack along sublanes).
    granule = 8 * max(1, 4 // itemsize)
    bytes_per_row = _LANES * itemsize
    cap_rows = max(granule, (_TILE_BYTES // bytes_per_row) // granule * granule)

    total_bytes = rows * bytes_per_row
    if rows <= cap_rows and total_bytes < _MEGACORE_MIN_BYTES:
        # Small input: a single block covering the full array (full-dim blocks are
        # always layout-legal — no (8,128) divisibility requirement, no masking).
        tile_rows = rows
    else:
        # Large input: multiple-of-`granule` blocks <= ~2 MiB, last block masked
        # by the cdiv grid (no exact-divisor requirement).
        tile_rows = min(cap_rows, (rows // granule) * granule)
        # v7x megacore: guarantee >= 2 grid steps so ("parallel",) uses both TCs.
        half = pl.cdiv(pl.cdiv(rows, 2), granule) * granule
        tile_rows = min(tile_rows, half)
        tile_rows = max(tile_rows, granule)

    grid = (pl.cdiv(rows, tile_rows),)

    out2d = pl.pallas_call(
        _exp10_kernel,
        out_shape=jax.ShapeDtypeStruct((rows, _LANES), orig_dtype),
        grid=grid,
        in_specs=[pl.BlockSpec((tile_rows, _LANES), lambda i: (i, 0))],
        out_specs=pl.BlockSpec((tile_rows, _LANES), lambda i: (i, 0)),
        compiler_params=pltpu.CompilerParams(
            dimension_semantics=("parallel",),      # shard grid across v7x's 2 TCs
            vmem_limit_bytes=32 * 1024 * 1024,      # headroom over v5e's 16 MiB default
        ),
    )(x2d)

    out_flat = out2d.reshape(-1)
    if rem != 0:
        out_flat = out_flat[:n]
    return out_flat.reshape(orig_shape)


if __name__ == "__main__":
    key = jax.random.PRNGKey(0)
    x = jax.random.normal(key, (2, 4, 16, 16), dtype=jnp.float32)

    out = exponential_layer(x)
    out = jax.block_until_ready(out)

    # correctness check against plain-JAX reference of the PyTorch semantics
    ref = jnp.exp(x * jnp.log(jnp.float32(10.0)))
    assert out.shape == x.shape and out.dtype == x.dtype
    assert jnp.allclose(out, ref, rtol=1e-6, atol=1e-6)

    print("KERNEL_OK")
</pallas_src>

<mosaic_0001>
module attributes {stable_mosaic.version = 11 : i64} {
  func.func @_exp10_kernel(%arg0: i32, %arg1: memref<16x128xf32, #tpu.memory_space<vmem>>, %arg2: memref<16x128xf32, #tpu.memory_space<vmem>>) attributes {dimension_semantics = [#tpu.dimension_semantics<parallel>], iteration_bounds = array<i64: 1>, scalar_prefetch = 0 : i64, scratch_operands = 0 : i64, tpu.core_type = #tpu.core_type<tc>, window_params = [{transform_indices = @transform_0, window_bounds = array<i64: 16, 128>}, {transform_indices = @transform_1, window_bounds = array<i64: 16, 128>}]} {
    %c0 = arith.constant 0 : index
    %c0_0 = arith.constant 0 : index
    %0 = vector.load %arg1[%c0, %c0_0] : memref<16x128xf32, #tpu.memory_space<vmem>>, vector<16x128xf32>
    %cst = arith.constant 2.30258512 : f32
    %1 = vector.broadcast %cst : f32 to vector<16x128xf32>
    %2 = arith.mulf %0, %1 : vector<16x128xf32>
    %3 = math.exp %2 : vector<16x128xf32>
    %c0_1 = arith.constant 0 : index
    %c0_2 = arith.constant 0 : index
    %4 = vector.load %arg2[%c0_1, %c0_2] : memref<16x128xf32, #tpu.memory_space<vmem>>, vector<16x128xf32>
    tpu.vector_store %arg2[%c0_1, %c0_2], %3 {strides = array<i32>} : memref<16x128xf32, #tpu.memory_space<vmem>>, vector<16x128xf32>,
    return
  }
  func.func @transform_0(%arg0: i32) -> (i32, i32) {
    %c0_i32 = arith.constant 0 : i32
    %c0_i32_0 = arith.constant 0 : i32
    return %arg0, %c0_i32 : i32, i32
  }
  func.func @transform_1(%arg0: i32) -> (i32, i32) {
    %c0_i32 = arith.constant 0 : i32
    %c0_i32_0 = arith.constant 0 : i32
    return %arg0, %c0_i32 : i32, i32
  }
}

</mosaic_0001>

<bundles_post_ra>
// kernel: tpu_custom_call.1
= control target key start
LH: loop header
LB: loop body
LE: loop exit
PB: predicated region body
PF: predicated region fallthrough
CT: control target
= control target key end

     0   :  { %6 = vsyncpa [#allocation3], 0  ;;  %s150_s0 = inlined_call_operand.hbm [shape: f32[16,128], index: 0, kind: input, shape index: {}]   ;;  %s151_s1 = inlined_call_operand.hbm [shape: f32[16,128], index: 1, kind: output, shape index: {}]  }
   0x1   :  { %7 = vsyncpa [#allocation4], 0  ;;  %s106_s6 = smov [#allocation2]   ;;  %s58_s10 = scalar_lea.hbm %s150_s0, 256 }
   0x2   :  { %s13_s7 = sshll.u32 %s106_s6, 4  ;;  %p59_p0 = scmp.ne.s32.totalorder %s150_s0, %s58_s10  ;;  %s14_s7 = int_to_ptr.vmem [resolvable:$true] %s13_s7 }
   0x3   :  { %p62_p1 = scmp.lt.u32.totalorder %s58_s10, %s150_s0 }
   0x5   :  { %p64_p2 = pnand %p62_p1, %p59_p0 }
   0x7   :  { %67 = shalt.err (!%p64_p2)
}
   0x8   :  { %s68_s15 = scalar_lea.vmem %s14_s7, 256  ;;  %p73_p4 = scmp.lt.s32.totalorder %s14_s7, %s14_s7 }
   0x9   :  { %p69_p3 = scmp.ne.s32.totalorder %s14_s7, %s68_s15  ;;  %p74_p5 = scmp.lt.s32.totalorder %s68_s15, %s68_s15 }
   0xb   :  { %p75_p6 = por %p74_p5, %p73_p4 }
   0xd   :  { %p76_p7 = pnand %p75_p6, %p69_p3 }
   0xf   :  { %79 = shalt.err (!%p76_p7)
}
  0x10   :  { %s107_s16 = smov 128   ;;  %s108_s17 = smov 8  }
  0x11   :  { %19 = dma.hbm_to_vmem [thread:$0]  %s150_s0, 256, %s14_s7, [#allocation3], %s107_s16, %s107_s16, %s108_s17  }
  0x12   :  { %102 = dma.done.wait [#allocation3], 256  }
  0x13   :  { %103 = vsyncadd [#allocation3], 4294967040  ;;  %v23_v0 = vld [vmem:[#allocation2] sm:$0xff]  ;;  %v24_v1 = vld [vmem:[#allocation2 + $0x8] sm:$0xff]  ;;  %s109_s20 = smov [#allocation5]  }
  0x14   :  { %v25_v2 = vmul.f32 2.3025851, %v23_v0  ;;  %v26_v3 = vmul.f32 2.3025851, %v24_v1  ;;  %s38_s21 = sshll.u32 %s109_s20, 4  ;;  %s39_s21 = int_to_ptr.vmem [resolvable:$true] %s38_s21 }
  0x15   :  { %s80_s22 = scalar_lea.vmem %s39_s21, 256  ;;  %p85_p9 = scmp.lt.s32.totalorder %s39_s21, %s39_s21 }
  0x16   :  { %v27_v4 = vmul.f32 1.442695, %v25_v2  ;;  %v29_v5 = vmul.f32 1.442695, %v26_v3  ;;  %p81_p8 = scmp.ne.s32.totalorder %s39_s21, %s80_s22  ;;  %p86_p10 = scmp.lt.s32.totalorder %s80_s22, %s80_s22 }
  0x18   :  { %54 = vpow2.f32 %v27_v4  ;;  %p87_p11 = por %p86_p10, %p85_p9 }
  0x19   :  { %56 = vpow2.f32 %v29_v5 }
  0x1a   :  { %p88_p12 = pnand %p87_p11, %p81_p8 }
  0x22   :  { %v55_v6 = vpop.eup %54 }
  0x23   :  { %v57_v7 = vpop.eup %56  ;;  %31 = vst [vmem:[#allocation5] sm:$0xff] %v55_v6 }
  0x24   :  { %32 = vst [vmem:[#allocation5 + $0x8] sm:$0xff] %v57_v7 }
  0x25   :  { %91 = shalt.err (!%p88_p12)
}
  0x26   :  { %s92_s24 = scalar_lea.hbm %s151_s1, 256 }
  0x27   :  { %p93_p13 = scmp.ne.s32.totalorder %s151_s1, %s92_s24  ;;  %p96_p0 = scmp.lt.u32.totalorder %s92_s24, %s151_s1 }
  0x29   :  { %p98_p1 = pnand %p96_p0, %p93_p13 }
  0x2b   :  { %101 = shalt.err (!%p98_p1)
}
  0x2c   :  { %44 = dma.vmem_to_hbm [thread:$0]  %s39_s21, 256, %s151_s1, [#allocation4], %s107_s16, %s107_s16, %s108_s17  }
  0x2d   :  { %104 = dma.done.wait [#allocation4], 256  }
  0x2e   :  { %105 = vsyncadd [#allocation4], 4294967040 }
  0x2f   :  { %48 = vsyncpa [#allocation3], 1 }
  0x30   :  { %49 = vsyncpa [#allocation4], 1 }

</bundles_post_ra>
